<compile_context>
chip_gen: v7x
topology: tpu7x:2x2x1
jax: 0.10.0
libtpu: 0.0.40
codegen_flags: <defaults>
</compile_context>

<pallas_src>
import jax
import jax.numpy as jnp
from jax.experimental import pallas as pl
from jax.experimental.pallas import tpu as pltpu


def _sse1d_kernel(x_ref, w_ref, b_ref, o_ref):
    # x_ref : (1, C, TW) VMEM tile (one batch element, one spatial tile)
    # w_ref : (1, C)     VMEM conv weight (replicated across the grid)
    # b_ref : (1,)       SMEM conv bias (f32)
    # o_ref : (1, C, TW) VMEM output tile
    x = x_ref[0]                                   # (C, TW), native dtype
    w = w_ref[...].astype(x.dtype)                 # (1, C)

    # 1x1 Conv1d (C -> 1): channel contraction as (1,C) @ (C,TW) on the MXU,
    # accumulated in f32.  Lane-wise independent, so partial last spatial
    # tiles are safe (garbage padded lanes never mix into valid lanes and are
    # masked on store).
    s = jax.lax.dot_general(
        w, x,
        dimension_numbers=(((1,), (0,)), ((), ())),
        preferred_element_type=jnp.float32,
    ) + b_ref[0]                                   # (1, TW) f32

    gate = jax.nn.sigmoid(s)                       # (1, TW) f32

    # Spatial excitation: broadcast over channels; multiply in native dtype.
    o_ref[0] = x * gate.astype(x.dtype)            # (C, TW)


def _choose_spatial_tile(W, C, itemsize):
    """Largest lane-dense spatial tile (multiple of 128, capped at 2048) that
    keeps double-buffered in+out blocks comfortably under the smallest default
    scoped-VMEM budget (16 MiB on v5e; also fine for v7x's 64 MiB VMEM)."""
    per_block_budget = 2 * 1024 * 1024             # bytes; 4 buffers -> <= 8 MiB
    max_lanes = (per_block_budget // max(1, C * itemsize)) // 128 * 128
    max_lanes = max(128, min(2048, max_lanes))
    if W <= max_lanes:
        # Single full-extent spatial block; legal for any W (incl. W < 128,
        # though lane-dense W >= 128 is strongly preferred for throughput).
        return W
    return max_lanes


def spatial_se_1d(x, conv_weight, conv_bias):
    """Forward pass of SpatialSELayer1d.

    x:           (B, C, W)  input (NCW, same as PyTorch Conv1d input).
    conv_weight: (1, C, 1)  PyTorch Conv1d(C, 1, kernel_size=1) weight.
    conv_bias:   (1,)       PyTorch Conv1d bias.
    """
    B, C, W = x.shape
    w2 = conv_weight.reshape(1, C)
    b = conv_bias.reshape(1).astype(jnp.float32)

    itemsize = jnp.dtype(x.dtype).itemsize
    TW = _choose_spatial_tile(W, C, itemsize)
    n_w = pl.cdiv(W, TW)

    # Memory-bound op: one read + one write of x; ~2*C MACs + 1 mul per element.
    cost = pl.CostEstimate(
        flops=3 * B * C * W,
        transcendentals=B * W,
        bytes_accessed=2 * B * C * W * itemsize,
    )

    return pl.pallas_call(
        _sse1d_kernel,
        out_shape=jax.ShapeDtypeStruct((B, C, W), x.dtype),
        grid_spec=pltpu.PrefetchScalarGridSpec(
            num_scalar_prefetch=0,
            grid=(B, n_w),
            in_specs=[
                pl.BlockSpec((1, C, TW), lambda bi, wi: (bi, 0, wi)),  # x tile
                pl.BlockSpec((1, C), lambda bi, wi: (0, 0)),           # weight
                pl.BlockSpec(memory_space=pltpu.SMEM),                 # bias
            ],
            out_specs=pl.BlockSpec((1, C, TW), lambda bi, wi: (bi, 0, wi)),
        ),
        compiler_params=pltpu.CompilerParams(
            # No carried state across grid steps -> both axes parallel
            # (lets v7x's two TensorCores split the grid).
            dimension_semantics=("parallel", "parallel"),
        ),
        cost_estimate=cost,
    )(x, w2, b)


if __name__ == "__main__":
    # Small shapes consistent with the module: (batch, channels, width)
    B, C, W = 2, 4, 16

    key = jax.random.PRNGKey(0)
    kx, kw, kb = jax.random.split(key, 3)

    x = jax.random.normal(kx, (B, C, W), dtype=jnp.float32)

    # Deterministic Conv1d(C, 1, 1) init (PyTorch-style uniform(-sqrt(k), sqrt(k)), k=1/C)
    bound = 1.0 / jnp.sqrt(jnp.float32(C))
    conv_weight = jax.random.uniform(kw, (1, C, 1), jnp.float32, -bound, bound)
    conv_bias = jax.random.uniform(kb, (1,), jnp.float32, -bound, bound)

    out = spatial_se_1d(x, conv_weight, conv_bias)
    out = jax.block_until_ready(out)

    # Pure-JAX reference for correctness
    s_ref = jnp.sum(x * conv_weight.reshape(1, C, 1), axis=1, keepdims=True) + conv_bias[0]
    ref = x * jax.nn.sigmoid(s_ref)

    assert out.shape == (B, C, W)
    assert jnp.allclose(out, ref, atol=1e-5, rtol=1e-5), "mismatch vs reference"

    print("KERNEL_OK")
</pallas_src>

<mosaic_0001>
module attributes {stable_mosaic.version = 11 : i64} {
  func.func @_sse1d_kernel(%arg0: i32, %arg1: i32, %arg2: memref<1x4x16xf32, #tpu.memory_space<vmem>>, %arg3: memref<1x4xf32, #tpu.memory_space<vmem>>, %arg4: memref<1xf32, #tpu.memory_space<smem>>, %arg5: memref<1x4x16xf32, #tpu.memory_space<vmem>>) attributes {dimension_semantics = [#tpu.dimension_semantics<parallel>, #tpu.dimension_semantics<parallel>], iteration_bounds = array<i64: 2, 1>, scalar_prefetch = 0 : i64, scratch_operands = 0 : i64, tpu.core_type = #tpu.core_type<tc>, window_params = [{transform_indices = @transform_0, window_bounds = array<i64: 1, 4, 16>}, {pipeline_mode = #tpu.pipeline_mode<synchronous>, transform_indices = @transform_1, window_bounds = array<i64: 1, 4>}, {transform_indices = @transform_2, window_bounds = array<i64: 1>}, {transform_indices = @transform_3, window_bounds = array<i64: 1, 4, 16>}]} {
    %c0 = arith.constant 0 : index
    %c0_0 = arith.constant 0 : index
    %c0_1 = arith.constant 0 : index
    %0 = vector.load %arg2[%c0, %c0_0, %c0_1] : memref<1x4x16xf32, #tpu.memory_space<vmem>>, vector<1x4x16xf32>
    %1 = vector.shape_cast %0 : vector<1x4x16xf32> to vector<4x16xf32>
    %c0_2 = arith.constant 0 : index
    %c0_3 = arith.constant 0 : index
    %2 = vector.load %arg3[%c0_2, %c0_3] : memref<1x4xf32, #tpu.memory_space<vmem>>, vector<1x4xf32>
    %cst = arith.constant dense<0.000000e+00> : vector<1x16xf32>
    %3 = tpu.matmul %2, %1, %cst {dimension_numbers = #tpu.dot_dimension_numbers<[1], [0], [0], [1], [0, 0, 1, 1], [], []>} : vector<1x4xf32>, vector<4x16xf32>, vector<1x16xf32> -> vector<1x16xf32>
    %c0_4 = arith.constant 0 : index
    %4 = memref.load %arg4[%c0_4] : memref<1xf32, #tpu.memory_space<smem>>
    %5 = vector.broadcast %4 : f32 to vector<1x16xf32>
    %6 = arith.addf %3, %5 : vector<1x16xf32>
    %7 = arith.negf %6 : vector<1x16xf32>
    %8 = math.exp %7 : vector<1x16xf32>
    %cst_5 = arith.constant 1.000000e+00 : f32
    %9 = vector.broadcast %cst_5 : f32 to vector<1x16xf32>
    %10 = arith.addf %9, %8 : vector<1x16xf32>
    %11 = arith.divf %9, %10 : vector<1x16xf32>
    %12 = vector.broadcast %11 : vector<1x16xf32> to vector<4x16xf32>
    %13 = arith.mulf %1, %12 : vector<4x16xf32>
    %c0_6 = arith.constant 0 : index
    %c0_7 = arith.constant 0 : index
    %c0_8 = arith.constant 0 : index
    %14 = vector.load %arg5[%c0_6, %c0_7, %c0_8] : memref<1x4x16xf32, #tpu.memory_space<vmem>>, vector<1x4x16xf32>
    %15 = vector.shape_cast %14 : vector<1x4x16xf32> to vector<4x16xf32>
    %16 = vector.shape_cast %13 : vector<4x16xf32> to vector<1x4x16xf32>
    tpu.vector_store %arg5[%c0_6, %c0_7, %c0_8], %16 {strides = array<i32>} : memref<1x4x16xf32, #tpu.memory_space<vmem>>, vector<1x4x16xf32>,
    return
  }
  func.func @transform_0(%arg0: i32, %arg1: i32) -> (i32, i32, i32) {
    %c0_i32 = arith.constant 0 : i32
    %c0_i32_0 = arith.constant 0 : i32
    return %arg0, %c0_i32, %arg1 : i32, i32, i32
  }
  func.func @transform_1(%arg0: i32, %arg1: i32) -> (i32, i32) {
    %c0_i32 = arith.constant 0 : i32
    %c0_i32_0 = arith.constant 0 : i32
    %c0_i32_1 = arith.constant 0 : i32
    return %c0_i32, %c0_i32_0 : i32, i32
  }
  func.func @transform_2(%arg0: i32, %arg1: i32) -> i32 {
    %c0_i32 = arith.constant 0 : i32
    %c0_i32_0 = arith.constant 0 : i32
    return %c0_i32 : i32
  }
  func.func @transform_3(%arg0: i32, %arg1: i32) -> (i32, i32, i32) {
    %c0_i32 = arith.constant 0 : i32
    %c0_i32_0 = arith.constant 0 : i32
    return %arg0, %c0_i32, %arg1 : i32, i32, i32
  }
}

</mosaic_0001>

<bundles_post_ra>
// kernel: tpu_custom_call.1
= control target key start
LH: loop header
LB: loop body
LE: loop exit
PB: predicated region body
PF: predicated region fallthrough
CT: control target
= control target key end

     0   :  { %s805_s0 = inlined_call_operand.hbm [shape: f32[2,4,16], index: 0, kind: input, shape index: {}]   ;;  %s806_s1 = inlined_call_operand.vmem [shape: f32[1,4], index: 1, kind: input, shape index: {}]   ;;  %s807_s2 = inlined_call_operand.<no memory space> [shape: f32[1], index: 2, kind: input, shape index: {}]   ;;  %s808_s3 = inlined_call_operand.hbm [shape: f32[2,4,16], index: 3, kind: output, shape index: {}]  }
   0x1   :  { %8 = sst [smem:[#allocation2]] %s807_s2 }
   0x2   :  { %9 = vsyncpa [#allocation4], 0 }
   0x3   :  { %11 = vsyncpa [#allocation4 + $0x1], 0 }
   0x4   :  { %12 = vsyncpa [#allocation5], 0 }
   0x5   :  { %14 = vsyncpa [#allocation5 + $0x1], 0  ;;  %s626_s14 = smov 0   ;;  %s628_s15 = smov 0  }
   0x6   :  { %s630_s16 = smov 0   ;;  %s632_s17 = smov 0  }
   0x7   :  { %s634_s18 = smov 0   ;;  %s636_s19 = smov 0  }
   0x8 LB: > { %s394_s2 = sadd.s32 4294967295, %s597_s19   ;;  %s395_s20 = sadd.s32 4294967294, %s597_s19   ;;  %s597_s19 = sphi %s636_s19, %s20_s19   ;;  %s593_s18 = sphi %s634_s18, %s824_s18   ;;  %s589_s17 = sphi %s632_s17, %s823_s17   ;;  %s585_s16 = sphi %s630_s16, %s822_s16   ;;  %s581_s15 = sphi %s628_s15, %s821_s15   ;;  %s577_s14 = sphi %s626_s14, %s820_s14  }
   0x9   : > { %s32_s21 = sadd.s32 1, %s593_s18  ;;  %s41_s22 = sadd.s32 1, %s585_s16 }
   0xa   : > { %p34_p0 = scmp.ge.s32.totalorder %s32_s21, 2  ;;  %p48_p1 = scmp.ne.s32.totalorder %s585_s16, %s581_s15 }
   0xb   : > { %p49_p2 = scmp.eq.s32.totalorder %s597_s19, 0  ;;  %p54_p3 = scmp.ne.s32.totalorder %s581_s15, %s577_s14 }
   0xc   : > { %s826_s21 = smov (%p34_p0, %s32_s21), 0  ;;  %p55_p5 = scmp.eq.s32.totalorder %s394_s2, 0 }
   0xd   : > { %p667_p4 = por %p49_p2, %p48_p1  ;;  %s36_s24 = ssub.s32 %s593_s18, %s826_s21 }
   0xe   : > { %p122_p6 = scmp.eq.s32.totalorder %s394_s2, 1  ;;  %p39_p7 = scmp.eq.s32.totalorder %s36_s24, 0 }
   0xf   : > { %p673_p8 = por %p55_p5, %p54_p3  ;;  %p128_p10 = scmp.eq.s32.totalorder %s395_s20, 1 }
  0x10   : > { %p677_p9 = por %p122_p6, %p48_p1  ;;  %p429_p13 = scmp.lt.s32.totalorder %s597_s19, 2 }
  0x11   : > { %s682_s27 = scalar_select %p39_p7, %s585_s16, %s41_s22  }
  0x12   : > { %s812_s26 = scalar_select %p677_p9, 1, 0 }
  0x13   : > { %p684_p11 = por %p128_p10, %p54_p3  ;;  %s154_s29 = sand.u32 1, %s585_s16  }
  0x14   : > { %s398_s30 = sshll.u32 %s154_s29, 2  ;;  %s399_s4 = sshll.u32 %s593_s18, 6 }
  0x15   : > { %s813_s28 = scalar_select %p684_p11, 1, 0 }
  0x16   : > { %s695_s7 = scalar_lea.hbm %s805_s0, %s399_s4  ;;  %s158_s8 = scalar_lea.vmem [#allocation3], %s398_s30 }
  0x17   : > { %s166_s9 = sshll.u32 %s158_s8, 4  ;;  %p701_p0 = pnand %p429_p13, %p667_p4  ;;  %s697_s9 = int_to_ptr.vmem [resolvable:$true] %s166_s9 }
  0x18   : > { %s155_s11 = scalar_lea.sflag [#allocation4], %s154_s29  ;;  %s485_s12 = scalar_lea.hbm %s695_s7, 64 }
  0x19   : > { %p486_p3 = scmp.ne.s32.totalorder %s695_s7, %s485_s12  ;;  %p487_p5 = pneg %p701_p0 }
  0x1a   : > { %s490_s20 = scalar_lea.hbm %s805_s0, 128  ;;  %p491_p4 = scmp.lt.u32.totalorder %s695_s7, %s805_s0 }
  0x1b   : > { %p488_p6 = pnand %p487_p5, %p486_p3  ;;  %p492_p10 = scmp.lt.u32.totalorder %s490_s20, %s485_s12 }
  0x1c   : > { %p494_p12 = scmp.lt.u32.totalorder %s485_s12, %s695_s7 }
  0x1d   : > { %p489_p7 = pneg %p488_p6  ;;  %p493_p13 = por %p492_p10, %p491_p4 }
  0x1f   : > { %p495_p1 = por %p494_p12, %p493_p13 }
  0x21   : > { %p496_p2 = pnand %p495_p1, %p489_p7 }
  0x23   : > { %499 = shalt.err (!%p496_p2)
}
  0x24   : > { %s500_s24 = scalar_lea.vmem %s697_s9, 64  ;;  %s599_s29 = smov [#allocation3]  }
  0x25   : > { %p501_p3 = scmp.ne.s32.totalorder %s697_s9, %s500_s24  ;;  %s505_s30 = sshll.u32 %s599_s29, 4  ;;  %s506_s30 = int_to_ptr.vmem [resolvable:$false] %s505_s30 }
  0x26   : > { %s507_s4 = scalar_lea.vmem %s506_s30, 128  ;;  %p508_p9 = scmp.lt.s32.totalorder %s697_s9, %s506_s30 }
  0x27   : > { %p503_p6 = pnand %p501_p3, %p487_p5  ;;  %p509_p4 = scmp.lt.s32.totalorder %s507_s4, %s500_s24 }
  0x29   : > { %p504_p11 = pneg %p503_p6  ;;  %p510_p10 = por %p509_p4, %p508_p9 }
  0x2b   : > { %p511_p12 = pnand %p510_p10, %p504_p11 }
  0x2d   : > { %514 = shalt.err (!%p511_p12)
}
  0x2e   : > { %424 = dma.hbm_to_vmem [thread:$0]  (!%p701_p0), %s695_s7, 64, %s697_s9, %s155_s11  }
  0x2f   : > { %p815_p1 = scmp.lt.s32.totalorder %s597_s19, 3  ;;  %p816_p2 = scmp.ge.s32.totalorder %s597_s19, 1 }
  0x31   : > { %p172_p5 = pnand %p816_p2, %p815_p1 }
  0x32   : > { %s737_s5 = sand.u32 (!%p172_p5), 1, %s581_s15  }
  0x33   : > { %175 = sbr.rel (%p172_p5) target bundleno = 320 (0x140), region = 32  ;;  %s401_s6 = sshll.u32 (!%p172_p5), %s737_s5, 2 }
  0x34   : > { %s178_s8 = scalar_lea.sflag (!%p172_p5), [#allocation4], %s737_s5  ;;  %s181_s10 = scalar_lea.vmem (!%p172_p5), [#allocation3], %s401_s6 }
  0x3a   : > { %568 = dma.done.wait (%p673_p8), %s178_s8, 64  }
  0x3b   : > { %570 = vsyncadd (%p673_p8), %s178_s8, 4294967232  ;;  %v600_v0 = vmov 0.0   ;;  %vm601_vm0 = vmmov 0   ;;  %vm212_vm1 = vcmask 1043456   ;;  %vm208_vm2 = vcmask 31744   ;;  %s206_s11 = sld [smem:[#allocation2]] }
  0x3c   : > { %412 = vmatprep.subr.mxu0 %v600_v0  ;;  %414 = vmatprep.mubr.msk.f32.mxu0 %vm601_vm0, %v600_v0  ;;  %v204_v1 = vld [vmem:[%s181_s10] sm:$0xf]  ;;  %v292_v10 = vlaneseq  ;;  %s407_s25 = sshll.u32 %s589_s17, 6  ;;  %s203_s12 = scalar_lea.vmem [#allocation6], %s401_s6  ;;  %vm297_vm3 = vcmask 125952  }
  0x3d   : > { %v205_v2 = vld [vmem:[%s806_s1] sm:$0x1]  ;;  %413 = vmatpush3.msk.msra.mxu0 %vm212_vm1, %v204_v1  ;;  %s314_s13 = sshll.u32 %s203_s12, 4  ;;  %s756_s22 = scalar_lea.hbm %s808_s3, %s407_s25  ;;  %s758_s13 = int_to_ptr.vmem [resolvable:$true] %s314_s13 }
  0x3e   : > { %415 = vmatmul.mubr.msk.f32.vlgmr.msra.gmra.mrb[0].mxu0 %vm208_vm2, %v205_v2  ;;  %v293_v11 = vshrl.u32 %v292_v10, 7  ;;  %s300_s23 = scalar_lea.sflag [#allocation5], %s737_s5  ;;  %s515_s24 = scalar_lea.vmem %s758_s13, 64 }
  0x3f   : > { %p516_p8 = scmp.ne.s32.totalorder %s758_s13, %s515_s24  ;;  %p817_p9 = scmp.ne.s32.totalorder %s812_s26, 0 }
  0x40   : > { %v294_v12 = vsub.s32 0, %v293_v11  ;;  %s602_s17 = smov [#allocation6]  }
  0x41   : > { %v207_v3 = vstv %s206_s11  ;;  %p517_p11 = pnand %p516_p8, %p817_p9  ;;  %s519_s29 = sshll.u32 %s602_s17, 4  ;;  %s520_s29 = int_to_ptr.vmem [resolvable:$false] %s519_s29 }
  0x42   : > { %s521_s30 = scalar_lea.vmem %s520_s29, 128  ;;  %p522_p7 = scmp.lt.s32.totalorder %s758_s13, %s520_s29 }
  0x43   : > { %p518_p0 = pneg %p517_p11  ;;  %p523_p13 = scmp.lt.s32.totalorder %s521_s30, %s515_s24 }
  0x45   : > { %p524_p3 = por %p523_p13, %p522_p7 }
  0x47   : > { %p525_p6 = pnand %p524_p3, %p518_p0 }
 0x111   : > { %v282_v4 = vpop.f32.mrb[0].mxu0 }
 0x112   : > { %v283_v5 = vadd.f32 %v282_v4, %v207_v3  ;;  %v416_v6 = vpop.f32.mrb[1].mxu0 }
 0x114   : > { %v405_v7 = vmul.f32 -1.442695, %v283_v5 }
 0x116   : > { %481 = vpow2.f32 %v405_v7 }
 0x120   : > { %v482_v8 = vpop.eup %481 }
 0x121   : > { %v289_v9 = vadd.f32 1.0, %v482_v8 }
 0x123   : > { %483 = vrcp.f32 %v289_v9 }
 0x12d   : > { %v484_v13 = vpop.eup %483 }
 0x12e   : > { %v295_v14 = vrot.slane %v484_v13, %v294_v12 }
 0x130   : > { %v296_v15 = vmul.f32 %v295_v14, %v204_v1 }
 0x132   : > { %298 = vst.msk [vmem:[%s203_s12] sm:$0xf] %vm297_vm3, %v296_v15 }
 0x133   : > { %528 = shalt.err (!%p525_p6)
}
 0x134   : > { %s529_s4 = scalar_lea.hbm %s756_s22, 64  ;;  %s533_s8 = scalar_lea.hbm %s808_s3, 128 }
 0x135   : > { %p530_p4 = scmp.ne.s32.totalorder %s756_s22, %s529_s4  ;;  %p534_p1 = scmp.lt.u32.totalorder %s756_s22, %s808_s3 }
 0x136   : > { %p535_p2 = scmp.lt.u32.totalorder %s533_s8, %s529_s4  ;;  %p537_p8 = scmp.lt.u32.totalorder %s529_s4, %s756_s22 }
 0x137   : > { %p531_p10 = pnand %p530_p4, %p817_p9 }
 0x138   : > { %p536_p5 = por %p535_p2, %p534_p1 }
 0x139   : > { %p532_p12 = pneg %p531_p10 }
 0x13a   : > { %p538_p11 = por %p537_p8, %p536_p5 }
 0x13c   : > { %p539_p0 = pnand %p538_p11, %p532_p12 }
 0x13e   : > { %542 = shalt.err (!%p539_p0)
}
 0x13f   : > { %419 = dma.vmem_to_hbm [thread:$0]  (%p817_p9), %s758_s13, 64, %s756_s22, %s300_s23  }
 0x140 PF: > { %s326_s9 = sand.u32 1, %s577_s14   ;;  %p818_p7 = scmp.ne.s32.totalorder %s813_s28, 0 }
 0x141   : > { %p819_p13 = scmp.ge.s32.totalorder %s597_s19, 2  ;;  %s327_s11 = scalar_lea.sflag [#allocation5], %s326_s9 }
 0x143   : > { %p426_p3 = pnand %p819_p13, %p818_p7 }
 0x145   : > { %572 = dma.done.wait (!%p426_p3), %s327_s11, 64  }
 0x146   : > { %574 = vsyncadd (!%p426_p3), %s327_s11, 4294967232  ;;  %s20_s19 = sadd.s32 1, %s597_s19   ;;  %s820_s14 = smov %s581_s15 }
 0x147   : > { %p17_p6 = scmp.ge.s32.totalorder %s20_s19, 4   ;;  %s821_s15 = smov %s585_s16 }
 0x148   : > { %s822_s16 = smov %s682_s27  ;;  %s823_s17 = smov %s593_s18 }
 0x149   : > { %s824_s18 = smov %s826_s21  ;;  %19 = sbr.rel (!%p17_p6) target bundleno = 8 (0x8), region = 77 }
 0x150   :  { %332 = vsyncpa [#allocation4], 1 }
 0x151   :  { %334 = vsyncpa [#allocation4 + $0x1], 1 }
 0x152   :  { %335 = vsyncpa [#allocation5], 1 }
 0x153   :  { %337 = vsyncpa [#allocation5 + $0x1], 1 }

</bundles_post_ra>
